<compile_context>
chip_gen: v6e
topology: v6e:2x2x1
jax: 0.10.0
libtpu: 0.0.40
codegen_flags: <defaults>
</compile_context>

<pallas_src>
import functools

import jax
import jax.numpy as jnp
from jax.experimental import pallas as pl
from jax.experimental.pallas import tpu as pltpu

LANE = 128      # vreg lane width (all TPU generations)
SUBLANE = 8     # f32 sublane count


def _round_up(x, m):
    return ((x + m - 1) // m) * m


def mlp_kernel(x_ref, w0_ref, b0_ref, w1_ref, b1_ref, w2_ref, b2_ref, o_ref):
    """One batch tile: (TB, dim_in) -> (TB, dim_out_padded), lane-dense store."""
    # Layer 0: bf16 MXU matmul, f32 accumulate; bias + tanh in f32 (VPU/EUP).
    h = jnp.dot(x_ref[...], w0_ref[...], preferred_element_type=jnp.float32)
    h = jnp.tanh(h + b0_ref[...])
    # Layer 1
    h = jnp.dot(h.astype(w1_ref.dtype), w1_ref[...],
                preferred_element_type=jnp.float32)
    h = jnp.tanh(h + b1_ref[...])
    # Layer 2 (output head): no activation.
    h = jnp.dot(h.astype(w2_ref.dtype), w2_ref[...],
                preferred_element_type=jnp.float32)
    o_ref[...] = (h + b2_ref[...]).astype(o_ref.dtype)


def init_mlp_params(key, dim_in, dim_out, dim_hidden=32, num_hidden=2, sigma=0.01):
    """Mirror the PyTorch module's init: weight ~ N(0, sigma), bias ~ U(-sigma, sigma).
    Weights are returned already transposed to (in_features, out_features)."""
    dims = [dim_in] + [dim_hidden] * num_hidden + [dim_out]
    params = []
    for fan_in, fan_out in zip(dims[:-1], dims[1:]):
        key, kw, kb = jax.random.split(key, 3)
        w_t = sigma * jax.random.normal(kw, (fan_in, fan_out), dtype=jnp.float32)
        b = jax.random.uniform(kb, (fan_out,), minval=-sigma, maxval=sigma,
                               dtype=jnp.float32)
        params.append((w_t, b))
    return params


def prepare_params(params, compute_dtype=jnp.bfloat16):
    """One-time prep: zero-pad feature dims to the 128-lane width and cast
    weights to bf16 for the MXU (biases stay f32 for the f32 add/tanh chain).
    Padding is a mathematical no-op: padded weight rows/cols and bias entries
    are zero, so padded activation lanes stay exactly zero (tanh(0) = 0)."""
    prepared = []
    prev_pad = params[0][0].shape[0]   # dim_in kept as-is (full-dim block)
    for (w, b) in params:
        fan_in, fan_out = w.shape
        out_pad = _round_up(fan_out, LANE)
        w_p = jnp.zeros((prev_pad, out_pad), compute_dtype)
        w_p = w_p.at[:fan_in, :fan_out].set(w.astype(compute_dtype))
        b_p = jnp.zeros((1, out_pad), jnp.float32).at[0, :fan_out].set(b)
        prepared.append((w_p, b_p))
        prev_pad = out_pad
    return prepared


# TODO(synk): kernel body is specialized to the module default num_hidden=2
# (3 linear layers); other depths would need a generated/looped kernel body.
@functools.partial(jax.jit, static_argnames=("dim_out", "tb"))
def mlp_forward(x, prepared_params, dim_out, *, tb=128):
    """x: (B, dim_in) float32. prepared_params: output of prepare_params()."""
    (w0, b0), (w1, b1), (w2, b2) = prepared_params
    B, dim_in = x.shape
    out_pad = w2.shape[1]

    # Batch tiling: clamp tile to the (sublane-rounded) batch, then pad B up
    # to a multiple of the tile so the grid divides exactly.
    tb = min(tb, _round_up(B, SUBLANE))
    b_pad = _round_up(B, tb)
    x_bf16 = x.astype(jnp.bfloat16)
    if b_pad != B:
        x_bf16 = jnp.zeros((b_pad, dim_in), jnp.bfloat16).at[:B].set(x_bf16)

    # Weights/biases: full-array blocks, constant index_map -> VMEM-resident.
    resident = lambda a: pl.BlockSpec(a.shape, lambda i: (0,) * a.ndim)

    out = pl.pallas_call(
        mlp_kernel,
        out_shape=jax.ShapeDtypeStruct((b_pad, out_pad), jnp.float32),
        grid=(b_pad // tb,),
        in_specs=[
            pl.BlockSpec((tb, dim_in), lambda i: (i, 0)),   # stream batch tiles
            resident(w0), resident(b0),
            resident(w1), resident(b1),
            resident(w2), resident(b2),
        ],
        out_specs=pl.BlockSpec((tb, out_pad), lambda i: (i, 0)),
        compiler_params=pltpu.CompilerParams(
            dimension_semantics=("parallel",)),   # megacore sharding on v7x
    )(x_bf16, w0, b0, w1, b1, w2, b2)

    return out[:B, :dim_out]


def mlp_reference(x, params):
    """Plain-JAX f32 reference of the same forward pass."""
    h = x
    for (w, b) in params[:-1]:
        h = jnp.tanh(h @ w + b)
    w, b = params[-1]
    return h @ w + b


if __name__ == "__main__":
    key = jax.random.PRNGKey(0)
    # Small shapes consistent with the module defaults (dim_hidden=32,
    # num_hidden=2); batch chosen so the grid has >1 step.
    B, dim_in, dim_hidden, dim_out = 256, 16, 32, 8

    key, kx = jax.random.split(key)
    x = jax.random.normal(kx, (B, dim_in), dtype=jnp.float32)

    params = init_mlp_params(key, dim_in, dim_out, dim_hidden=dim_hidden,
                             num_hidden=2, sigma=0.01)
    prepared = prepare_params(params)

    out = mlp_forward(x, prepared, dim_out=dim_out, tb=128)
    out = jax.block_until_ready(out)

    ref = mlp_reference(x, params)
    assert out.shape == (B, dim_out), out.shape
    # bf16 MXU inputs (f32 accumulate) -> loosen the f32-only 1e-5 tolerance.
    max_err = float(jnp.max(jnp.abs(out - ref)))
    assert jnp.allclose(out, ref, atol=1e-3, rtol=1e-2), max_err

    print("KERNEL_OK")
</pallas_src>

<mosaic_0001>
module attributes {stable_mosaic.version = 11 : i64} {
  func.func @mlp_kernel(%arg0: i32, %arg1: memref<128x16xbf16, #tpu.memory_space<vmem>>, %arg2: memref<16x128xbf16, #tpu.memory_space<vmem>>, %arg3: memref<1x128xf32, #tpu.memory_space<vmem>>, %arg4: memref<128x128xbf16, #tpu.memory_space<vmem>>, %arg5: memref<1x128xf32, #tpu.memory_space<vmem>>, %arg6: memref<128x128xbf16, #tpu.memory_space<vmem>>, %arg7: memref<1x128xf32, #tpu.memory_space<vmem>>, %arg8: memref<128x128xf32, #tpu.memory_space<vmem>>) attributes {dimension_semantics = [#tpu.dimension_semantics<parallel>], iteration_bounds = array<i64: 2>, scalar_prefetch = 0 : i64, scratch_operands = 0 : i64, tpu.core_type = #tpu.core_type<tc>, window_params = [{transform_indices = @transform_0, window_bounds = array<i64: 128, 16>}, {pipeline_mode = #tpu.pipeline_mode<synchronous>, transform_indices = @transform_1, window_bounds = array<i64: 16, 128>}, {pipeline_mode = #tpu.pipeline_mode<synchronous>, transform_indices = @transform_2, window_bounds = array<i64: 1, 128>}, {pipeline_mode = #tpu.pipeline_mode<synchronous>, transform_indices = @transform_3, window_bounds = array<i64: 128, 128>}, {pipeline_mode = #tpu.pipeline_mode<synchronous>, transform_indices = @transform_4, window_bounds = array<i64: 1, 128>}, {pipeline_mode = #tpu.pipeline_mode<synchronous>, transform_indices = @transform_5, window_bounds = array<i64: 128, 128>}, {pipeline_mode = #tpu.pipeline_mode<synchronous>, transform_indices = @transform_6, window_bounds = array<i64: 1, 128>}, {transform_indices = @transform_7, window_bounds = array<i64: 128, 128>}]} {
    %c0 = arith.constant 0 : index
    %c0_0 = arith.constant 0 : index
    %0 = vector.load %arg1[%c0, %c0_0] : memref<128x16xbf16, #tpu.memory_space<vmem>>, vector<128x16xbf16>
    %c0_1 = arith.constant 0 : index
    %c0_2 = arith.constant 0 : index
    %1 = vector.load %arg2[%c0_1, %c0_2] : memref<16x128xbf16, #tpu.memory_space<vmem>>, vector<16x128xbf16>
    %cst = arith.constant dense<0.000000e+00> : vector<128x128xf32>
    %2 = tpu.matmul %0, %1, %cst {dimension_numbers = #tpu.dot_dimension_numbers<[1], [0], [0], [1], [0, 0, 1, 1], [], []>} : vector<128x16xbf16>, vector<16x128xbf16>, vector<128x128xf32> -> vector<128x128xf32>
    %c0_3 = arith.constant 0 : index
    %c0_4 = arith.constant 0 : index
    %3 = vector.load %arg3[%c0_3, %c0_4] : memref<1x128xf32, #tpu.memory_space<vmem>>, vector<1x128xf32>
    %4 = vector.broadcast %3 : vector<1x128xf32> to vector<128x128xf32>
    %5 = arith.addf %2, %4 : vector<128x128xf32>
    %6 = math.tanh %5 : vector<128x128xf32>
    %7 = arith.truncf %6 : vector<128x128xf32> to vector<128x128xbf16>
    %c0_5 = arith.constant 0 : index
    %c0_6 = arith.constant 0 : index
    %8 = vector.load %arg4[%c0_5, %c0_6] : memref<128x128xbf16, #tpu.memory_space<vmem>>, vector<128x128xbf16>
    %cst_7 = arith.constant dense<0.000000e+00> : vector<128x128xf32>
    %9 = tpu.matmul %7, %8, %cst_7 {dimension_numbers = #tpu.dot_dimension_numbers<[1], [0], [0], [1], [0, 0, 1, 1], [], []>} : vector<128x128xbf16>, vector<128x128xbf16>, vector<128x128xf32> -> vector<128x128xf32>
    %c0_8 = arith.constant 0 : index
    %c0_9 = arith.constant 0 : index
    %10 = vector.load %arg5[%c0_8, %c0_9] : memref<1x128xf32, #tpu.memory_space<vmem>>, vector<1x128xf32>
    %11 = vector.broadcast %10 : vector<1x128xf32> to vector<128x128xf32>
    %12 = arith.addf %9, %11 : vector<128x128xf32>
    %13 = math.tanh %12 : vector<128x128xf32>
    %14 = arith.truncf %13 : vector<128x128xf32> to vector<128x128xbf16>
    %c0_10 = arith.constant 0 : index
    %c0_11 = arith.constant 0 : index
    %15 = vector.load %arg6[%c0_10, %c0_11] : memref<128x128xbf16, #tpu.memory_space<vmem>>, vector<128x128xbf16>
    %cst_12 = arith.constant dense<0.000000e+00> : vector<128x128xf32>
    %16 = tpu.matmul %14, %15, %cst_12 {dimension_numbers = #tpu.dot_dimension_numbers<[1], [0], [0], [1], [0, 0, 1, 1], [], []>} : vector<128x128xbf16>, vector<128x128xbf16>, vector<128x128xf32> -> vector<128x128xf32>
    %c0_13 = arith.constant 0 : index
    %c0_14 = arith.constant 0 : index
    %17 = vector.load %arg7[%c0_13, %c0_14] : memref<1x128xf32, #tpu.memory_space<vmem>>, vector<1x128xf32>
    %18 = vector.broadcast %17 : vector<1x128xf32> to vector<128x128xf32>
    %19 = arith.addf %16, %18 : vector<128x128xf32>
    %c0_15 = arith.constant 0 : index
    %c0_16 = arith.constant 0 : index
    %20 = vector.load %arg8[%c0_15, %c0_16] : memref<128x128xf32, #tpu.memory_space<vmem>>, vector<128x128xf32>
    tpu.vector_store %arg8[%c0_15, %c0_16], %19 {strides = array<i32>} : memref<128x128xf32, #tpu.memory_space<vmem>>, vector<128x128xf32>,
    return
  }
  func.func @transform_0(%arg0: i32) -> (i32, i32) {
    %c0_i32 = arith.constant 0 : i32
    %c0_i32_0 = arith.constant 0 : i32
    return %arg0, %c0_i32 : i32, i32
  }
  func.func @transform_1(%arg0: i32) -> (i32, i32) {
    %c0_i32 = arith.constant 0 : i32
    %c0_i32_0 = arith.constant 0 : i32
    %c0_i32_1 = arith.constant 0 : i32
    return %c0_i32, %c0_i32_0 : i32, i32
  }
  func.func @transform_2(%arg0: i32) -> (i32, i32) {
    %c0_i32 = arith.constant 0 : i32
    %c0_i32_0 = arith.constant 0 : i32
    %c0_i32_1 = arith.constant 0 : i32
    return %c0_i32, %c0_i32_0 : i32, i32
  }
  func.func @transform_3(%arg0: i32) -> (i32, i32) {
    %c0_i32 = arith.constant 0 : i32
    %c0_i32_0 = arith.constant 0 : i32
    %c0_i32_1 = arith.constant 0 : i32
    return %c0_i32, %c0_i32_0 : i32, i32
  }
  func.func @transform_4(%arg0: i32) -> (i32, i32) {
    %c0_i32 = arith.constant 0 : i32
    %c0_i32_0 = arith.constant 0 : i32
    %c0_i32_1 = arith.constant 0 : i32
    return %c0_i32, %c0_i32_0 : i32, i32
  }
  func.func @transform_5(%arg0: i32) -> (i32, i32) {
    %c0_i32 = arith.constant 0 : i32
    %c0_i32_0 = arith.constant 0 : i32
    %c0_i32_1 = arith.constant 0 : i32
    return %c0_i32, %c0_i32_0 : i32, i32
  }
  func.func @transform_6(%arg0: i32) -> (i32, i32) {
    %c0_i32 = arith.constant 0 : i32
    %c0_i32_0 = arith.constant 0 : i32
    %c0_i32_1 = arith.constant 0 : i32
    return %c0_i32, %c0_i32_0 : i32, i32
  }
  func.func @transform_7(%arg0: i32) -> (i32, i32) {
    %c0_i32 = arith.constant 0 : i32
    %c0_i32_0 = arith.constant 0 : i32
    return %arg0, %c0_i32 : i32, i32
  }
}

</mosaic_0001>

<bundles_post_ra>
// kernel: mlp_forward.1
= control target key start
LH: loop header
LB: loop body
LE: loop exit
PB: predicated region body
PF: predicated region fallthrough
CT: control target
= control target key end

     0   :  { %s1247_s24 = smov 0   ;;  %s1354_s0 = inlined_call_operand.vmem [shape: bf16[256,16], index: 0, kind: input, shape index: {}]   ;;  %s1355_s1 = inlined_call_operand.vmem [shape: bf16[16,128], index: 1, kind: input, shape index: {}]   ;;  %s1356_s2 = inlined_call_operand.vmem [shape: f32[1,128], index: 2, kind: input, shape index: {}]   ;;  %s1357_s3 = inlined_call_operand.vmem [shape: bf16[128,128], index: 3, kind: input, shape index: {}]   ;;  %s1358_s4 = inlined_call_operand.vmem [shape: f32[1,128], index: 4, kind: input, shape index: {}]   ;;  %s1359_s5 = inlined_call_operand.vmem [shape: bf16[128,128], index: 5, kind: input, shape index: {}]   ;;  %s1360_s6 = inlined_call_operand.vmem [shape: f32[1,128], index: 6, kind: input, shape index: {}]   ;;  %s1361_s7 = inlined_call_operand.vmem [shape: f32[256,128], index: 7, kind: output, shape index: {}]  }
   0x1 LB: > { %s932_s25 = sadd.s32 4294967295, %s1205_s24   ;;  %p936_p0 = scmp.ge.s32.totalorder %s1205_s24, 1  ;;  %s1205_s24 = sphi %s1247_s24, %s17_s24  }
   0x2   : > { %p238_p1 = scmp.lt.s32.totalorder %s1205_s24, 3 }
   0x4   : > { %p239_p2 = pnand %p936_p0, %p238_p1 }
   0x5   : > { %s937_s28 = sshll.u32 (!%p239_p2), %s932_s25, 4 }
   0x6   : > { %242 = sbr.rel (%p239_p2) target bundleno = 678 (0x2a6), region = 48  ;;  %p271_p3 = scmp.lt.s32.totalorder (!%p239_p2), %s937_s28, 31 }
   0xb   : > { %v1110_v0 = vld [vmem:[%s1355_s1] sm:$0xff]   ;;  %v1119_v1 = vld [vmem:[%s1357_s3 + $0x38] sm:$0xff]   ;;  %s1363_s28 = smov (!%p271_p3, %s937_s28), 31  ;;  %v1120_v2 = vld [vmem:[%s1357_s3 + $0x30] sm:$0xff]   ;;  %vm354_vm0 = vcmask 130048  }
   0xc   : > { %1020 = vmatprep.subr.bf16.mxu0 %v1110_v0  ;;  %1038 = vmatprep.subr.bf16.mxu1 %v1119_v1  ;;  %s938_s10 = sshll.u32 %s1363_s28, 2  ;;  %v1121_v11 = vld [vmem:[%s1357_s3 + $0x28] sm:$0xff]   ;;  %v1122_v12 = vld [vmem:[%s1357_s3 + $0x20] sm:$0xff]   ;;  %v1123_v13 = vld [vmem:[%s1357_s3 + $0x18] sm:$0xff]   ;;  %s940_s26 = sshll.u32 %s1363_s28, 3 }
   0xd   : > { %1021 = vmatpush3.bf16.msra.mxu0 %v1110_v0  ;;  %1039 = vmatpush3.bf16.msra.mxu1 %v1119_v1  ;;  %s274_s13 = scalar_lea.vmem %s1354_s0, %s938_s10  ;;  %v1124_v14 = vld [vmem:[%s1357_s3 + $0x10] sm:$0xff]   ;;  %v1125_v15 = vld [vmem:[%s1357_s3 + $0x8] sm:$0xff]   ;;  %v1126_v16 = vld [vmem:[%s1357_s3] sm:$0xff]   ;;  %s1333_s9 = scalar_lea.vmem %s1361_s7, %s940_s26 }
   0xe   : > { %1040 = vmatprep.subr.bf16.mxu1 %v1120_v2  ;;  %v1111_v3 = vld [vmem:[%s274_s13] sm:$0xff]   ;;  %v1112_v4 = vld [vmem:[%s274_s13 + $0x8] sm:$0xff]   ;;  %v1113_v5 = vld [vmem:[%s274_s13 + $0x10] sm:$0xff]  }
   0xf   : > { %1022 = vmatprep.mubr.msk.bf16.mxu0 %vm354_vm0, %v1111_v3  ;;  %v1114_v6 = vld [vmem:[%s274_s13 + $0x18] sm:$0xff]   ;;  %v1115_v7 = vld [vmem:[%s274_s13 + $0x20] sm:$0xff]   ;;  %v1116_v8 = vld [vmem:[%s274_s13 + $0x28] sm:$0xff]  }
  0x10   : > { %1023 = vmatmul.mubr.msk.bf16.vlgmr.msra.gmra.mxu0 %vm354_vm0, %v1112_v4  ;;  %v1117_v9 = vld [vmem:[%s274_s13 + $0x30] sm:$0xff]   ;;  %v1118_v10 = vld [vmem:[%s274_s13 + $0x38] sm:$0xff]   ;;  %v941_v20 = vld [vmem:[%s1356_s2] ss:$0 sm:$0xff] }
  0x11   : > { %1041 = vmatpush3.bf16.msra.mxu1 %v1120_v2  ;;  %1026 = vmatprep.mubr.msk.bf16.mxu0 %vm354_vm0, %v1113_v5  ;;  %v1127_v17 = vld [vmem:[%s1359_s5 + $0x38] sm:$0xff]   ;;  %v1128_v18 = vld [vmem:[%s1359_s5 + $0x30] sm:$0xff]  }
  0x12   : > { %1042 = vmatprep.subr.bf16.mxu1 %v1121_v11  ;;  %1070 = vmatprep.subr.bf16.mxu0 %v1127_v17 }
  0x13   : > { %1071 = vmatpush3.bf16.msra.mxu0 %v1127_v17  ;;  %v1134_v17 = vld [vmem:[%s1359_s5] sm:$0xff]  }
  0x14   : > { %1072 = vmatprep.subr.bf16.mxu0 %v1128_v18 }
  0x15   : > { %1043 = vmatpush3.bf16.msra.mxu1 %v1121_v11 }
  0x16   : > { %1044 = vmatprep.subr.bf16.mxu1 %v1122_v12 }
  0x17   : > { %1073 = vmatpush3.bf16.msra.mxu0 %v1128_v18 }
  0x18   : > { %1027 = vmatmul.mubr.msk.bf16.gmra.mxu0 %vm354_vm0, %v1114_v6 }
  0x19   : > { %1030 = vmatprep.mubr.msk.bf16.mxu0 %vm354_vm0, %v1115_v7  ;;  %1045 = vmatpush3.bf16.msra.mxu1 %v1122_v12  ;;  %v1129_v12 = vld [vmem:[%s1359_s5 + $0x28] sm:$0xff]  }
  0x1a   : > { %1046 = vmatprep.subr.bf16.mxu1 %v1123_v13  ;;  %1074 = vmatprep.subr.bf16.mxu0 %v1129_v12 }
  0x1b   : > { %1075 = vmatpush3.bf16.msra.mxu0 %v1129_v12 }
  0x1d   : > { %1047 = vmatpush3.bf16.msra.mxu1 %v1123_v13  ;;  %v1130_v13 = vld [vmem:[%s1359_s5 + $0x20] sm:$0xff]  }
  0x1e   : > { %1048 = vmatprep.subr.bf16.mxu1 %v1124_v14  ;;  %1076 = vmatprep.subr.bf16.mxu0 %v1130_v13 }
  0x1f   : > { %1077 = vmatpush3.bf16.msra.mxu0 %v1130_v13 }
  0x20   : > { %1031 = vmatmul.mubr.msk.bf16.gmra.mxu0 %vm354_vm0, %v1116_v8 }
  0x21   : > { %1034 = vmatprep.mubr.msk.bf16.mxu0 %vm354_vm0, %v1117_v9  ;;  %1049 = vmatpush3.bf16.msra.mxu1 %v1124_v14  ;;  %v1131_v14 = vld [vmem:[%s1359_s5 + $0x18] sm:$0xff]  }
  0x22   : > { %1050 = vmatprep.subr.bf16.mxu1 %v1125_v15  ;;  %1078 = vmatprep.subr.bf16.mxu0 %v1131_v14 }
  0x23   : > { %1079 = vmatpush3.bf16.msra.mxu0 %v1131_v14 }
  0x25   : > { %1051 = vmatpush3.bf16.msra.mxu1 %v1125_v15  ;;  %v1132_v15 = vld [vmem:[%s1359_s5 + $0x10] sm:$0xff]  }
  0x26   : > { %1052 = vmatprep.subr.bf16.mxu1 %v1126_v16  ;;  %1080 = vmatprep.subr.bf16.mxu0 %v1132_v15 }
  0x27   : > { %1081 = vmatpush3.bf16.msra.mxu0 %v1132_v15 }
  0x28   : > { %1035 = vmatmul.mubr.msk.bf16.gmra.mxu0 %vm354_vm0, %v1118_v10 }
  0x29   : > { %1053 = vmatpush3.bf16.msra.mxu1 %v1126_v16  ;;  %v1133_v16 = vld [vmem:[%s1359_s5 + $0x8] sm:$0xff]  }
  0x2a   : > { %1082 = vmatprep.subr.bf16.mxu0 %v1133_v16 }
  0x2b   : > { %1083 = vmatpush3.bf16.msra.mxu0 %v1133_v16 }
  0x2c   : > { %1084 = vmatprep.subr.bf16.mxu0 %v1134_v17 }
  0x2f   : > { %1085 = vmatpush3.bf16.msra.mxu0 %v1134_v17 }
  0xd0   : > { %v1024_v19 = vpop.f32.mrf.mxu0 }
  0xd1   : > { %v422_v25 = vadd.f32 %v1024_v19, %v941_v20  ;;  %v959_v19 = vld [vmem:[%s1358_s4] ss:$0 sm:$0xff] }
  0xd2   : > { %v413_v21 = vpop.f32.mrf.mxu0 }
  0xd3   : > { %v414_v22 = vadd.f32 %v941_v20, %v413_v21 }
  0xd4   : > { %v1025_v23 = vpop.f32.mrf.mxu0 }
  0xd5   : > { %v425_v24 = vadd.f32 %v1025_v23, %v941_v20  ;;  %1135 = vtanh.f32 %v414_v22 }
  0xd6   : > { %v416_v26 = vpop.f32.mrf.mxu0 }
  0xd7   : > { %v417_v27 = vadd.f32 %v941_v20, %v416_v26  ;;  %1137 = vtanh.f32 %v425_v24 }
  0xd8   : > { %v1028_v28 = vpop.f32.mrf.mxu0 }
  0xd9   : > { %1139 = vtanh.f32 %v417_v27  ;;  %v438_v33 = vadd.f32 %v1028_v28, %v941_v20 }
  0xda   : > { %1141 = vtanh.f32 %v422_v25  ;;  %v429_v29 = vpop.f32.mrf.mxu0 }
  0xdb   : > { %v430_v30 = vadd.f32 %v941_v20, %v429_v29 }
  0xdc   : > { %v1029_v31 = vpop.f32.mrf.mxu0 }
  0xdd   : > { %v441_v32 = vadd.f32 %v1029_v31, %v941_v20  ;;  %1143 = vtanh.f32 %v430_v30 }
  0xde   : > { %v432_v34 = vpop.f32.mrf.mxu0 }
  0xdf   : > { %v433_v35 = vadd.f32 %v941_v20, %v432_v34  ;;  %1145 = vtanh.f32 %v441_v32 }
  0xe0   : > { %v1032_v36 = vpop.f32.mrf.mxu0 }
  0xe1   : > { %1147 = vtanh.f32 %v433_v35  ;;  %v454_v44 = vadd.f32 %v1032_v36, %v941_v20 }
  0xe2   : > { %1149 = vtanh.f32 %v438_v33  ;;  %v445_v37 = vpop.f32.mrf.mxu0  ;;  %v1136_v39 = vpop.eup %1135 }
  0xe3   : > { %v446_v38 = vadd.f32 %v941_v20, %v445_v37 }
  0xe4   : > { %v1033_v40 = vpop.f32.mrf.mxu0  ;;  %v1138_v41 = vpop.eup %1137 }
  0xe5   : > { %v457_v42 = vadd.f32 %v1033_v40, %v941_v20  ;;  %1151 = vtanh.f32 %v446_v38 }
  0xe6   : > { %v1140_v43 = vpop.eup %1139  ;;  %v448_v45 = vpop.f32.mrf.mxu0 }
  0xe7   : > { %v1142_v46 = vpop.eup %1141  ;;  %v449_v47 = vadd.f32 %v941_v20, %v448_v45  ;;  %v492_v48 = vpack.c.bf16 %v1140_v43, %v1136_v39  ;;  %1153 = vtanh.f32 %v457_v42 }
  0xe8   : > { %v1036_v49 = vpop.f32.mrf.mxu0  ;;  %v493_v50 = vpack.c.bf16 %v1138_v41, %v1142_v46 }
  0xe9   : > { %1155 = vtanh.f32 %v449_v47  ;;  %1054 = vmatprep.mubr.bf16.mxu1 %v492_v48  ;;  %v470_v58 = vadd.f32 %v1036_v49, %v941_v20 }
  0xea   : > { %1157 = vtanh.f32 %v454_v44  ;;  %v461_v51 = vpop.f32.mrf.mxu0  ;;  %1055 = vmatmul.mubr.bf16.vlgmr.msra.gmra.mxu1 %v493_v50  ;;  %v1144_v53 = vpop.eup %1143 }
  0xeb   : > { %v462_v52 = vadd.f32 %v941_v20, %v461_v51 }
  0xec   : > { %v1037_v54 = vpop.f32.mrf.mxu0  ;;  %v1146_v55 = vpop.eup %1145 }
  0xed   : > { %v473_v56 = vadd.f32 %v1037_v54, %v941_v20  ;;  %1159 = vtanh.f32 %v462_v52 }
  0xee   : > { %v1148_v57 = vpop.eup %1147  ;;  %v464_v59 = vpop.f32.mrf.mxu0 }
  0xef   : > { %v1150_v60 = vpop.eup %1149  ;;  %v465_v61 = vadd.f32 %v941_v20, %v464_v59  ;;  %v494_v62 = vpack.c.bf16 %v1148_v57, %v1144_v53  ;;  %1161 = vtanh.f32 %v473_v56 }
  0xf0   : > { %v495_v63 = vpack.c.bf16 %v1146_v55, %v1150_v60 }
  0xf1   : > { %1163 = vtanh.f32 %v465_v61  ;;  %1058 = vmatprep.mubr.bf16.mxu1 %v494_v62 }
  0xf2   : > { %1165 = vtanh.f32 %v470_v58  ;;  %1059 = vmatmul.mubr.bf16.gmra.mxu1 %v495_v63  ;;  %v1152_v0 = vpop.eup %1151 }
  0xf4   : > { %v1154_v1 = vpop.eup %1153 }
  0xf6   : > { %v1156_v2 = vpop.eup %1155 }
  0xf7   : > { %v1158_v3 = vpop.eup %1157  ;;  %v496_v4 = vpack.c.bf16 %v1156_v2, %v1152_v0 }
  0xf8   : > { %v497_v5 = vpack.c.bf16 %v1154_v1, %v1158_v3 }
  0xf9   : > { %1062 = vmatprep.mubr.bf16.mxu1 %v496_v4 }
  0xfa   : > { %1063 = vmatmul.mubr.bf16.gmra.mxu1 %v497_v5  ;;  %v1160_v6 = vpop.eup %1159 }
  0xfc   : > { %v1162_v7 = vpop.eup %1161 }
  0xfe   : > { %v1164_v8 = vpop.eup %1163 }
  0xff   : > { %v1166_v9 = vpop.eup %1165  ;;  %v498_v10 = vpack.c.bf16 %v1164_v8, %v1160_v6 }
 0x100   : > { %v499_v11 = vpack.c.bf16 %v1162_v7, %v1166_v9 }
 0x101   : > { %1066 = vmatprep.mubr.bf16.mxu1 %v498_v10 }
 0x102   : > { %1067 = vmatmul.mubr.bf16.gmra.mxu1 %v499_v11  ;;  %v968_v11 = vld [vmem:[%s1360_s6] ss:$0 sm:$0xff] }
 0x1aa   : > { %v1056_v18 = vpop.f32.mrf.mxu1 }
 0x1ab   : > { %v614_v24 = vadd.f32 %v1056_v18, %v959_v19 }
 0x1ac   : > { %v605_v20 = vpop.f32.mrf.mxu1 }
 0x1ad   : > { %v606_v21 = vadd.f32 %v959_v19, %v605_v20 }
 0x1ae   : > { %v1057_v22 = vpop.f32.mrf.mxu1 }
 0x1af   : > { %v617_v23 = vadd.f32 %v1057_v22, %v959_v19  ;;  %1167 = vtanh.f32 %v606_v21 }
 0x1b0   : > { %v608_v25 = vpop.f32.mrf.mxu1 }
 0x1b1   : > { %v609_v26 = vadd.f32 %v959_v19, %v608_v25  ;;  %1169 = vtanh.f32 %v617_v23 }
 0x1b2   : > { %v1060_v27 = vpop.f32.mrf.mxu1 }
 0x1b3   : > { %1171 = vtanh.f32 %v609_v26  ;;  %v630_v32 = vadd.f32 %v1060_v27, %v959_v19 }
 0x1b4   : > { %1173 = vtanh.f32 %v614_v24  ;;  %v621_v28 = vpop.f32.mrf.mxu1 }
 0x1b5   : > { %v622_v29 = vadd.f32 %v959_v19, %v621_v28 }
 0x1b6   : > { %v1061_v30 = vpop.f32.mrf.mxu1 }
 0x1b7   : > { %v633_v31 = vadd.f32 %v1061_v30, %v959_v19  ;;  %1175 = vtanh.f32 %v622_v29 }
 0x1b8   : > { %v624_v33 = vpop.f32.mrf.mxu1 }
 0x1b9   : > { %v625_v34 = vadd.f32 %v959_v19, %v624_v33  ;;  %1177 = vtanh.f32 %v633_v31 }
 0x1ba   : > { %v1064_v35 = vpop.f32.mrf.mxu1 }
 0x1bb   : > { %1179 = vtanh.f32 %v625_v34  ;;  %v646_v43 = vadd.f32 %v1064_v35, %v959_v19 }
 0x1bc   : > { %1181 = vtanh.f32 %v630_v32  ;;  %v637_v36 = vpop.f32.mrf.mxu1  ;;  %v1168_v38 = vpop.eup %1167 }
 0x1bd   : > { %v638_v37 = vadd.f32 %v959_v19, %v637_v36 }
 0x1be   : > { %v1065_v39 = vpop.f32.mrf.mxu1  ;;  %v1170_v40 = vpop.eup %1169 }
 0x1bf   : > { %v649_v41 = vadd.f32 %v1065_v39, %v959_v19  ;;  %1183 = vtanh.f32 %v638_v37 }
 0x1c0   : > { %v1172_v42 = vpop.eup %1171  ;;  %v640_v44 = vpop.f32.mrf.mxu1 }
 0x1c1   : > { %v1174_v45 = vpop.eup %1173  ;;  %v641_v46 = vadd.f32 %v959_v19, %v640_v44  ;;  %v684_v47 = vpack.c.bf16 %v1172_v42, %v1168_v38  ;;  %1185 = vtanh.f32 %v649_v41 }
 0x1c2   : > { %v1068_v48 = vpop.f32.mrf.mxu1  ;;  %v685_v49 = vpack.c.bf16 %v1170_v40, %v1174_v45 }
 0x1c3   : > { %1187 = vtanh.f32 %v641_v46  ;;  %1086 = vmatprep.mubr.bf16.mxu0 %v684_v47  ;;  %v662_v57 = vadd.f32 %v1068_v48, %v959_v19 }
 0x1c4   : > { %1189 = vtanh.f32 %v646_v43  ;;  %v653_v50 = vpop.f32.mrf.mxu1  ;;  %1087 = vmatmul.mubr.bf16.vlgmr.msra.gmra.mxu0 %v685_v49  ;;  %v1176_v52 = vpop.eup %1175 }
 0x1c5   : > { %v654_v51 = vadd.f32 %v959_v19, %v653_v50 }
 0x1c6   : > { %v1069_v53 = vpop.f32.mrf.mxu1  ;;  %v1178_v54 = vpop.eup %1177 }
 0x1c7   : > { %v665_v55 = vadd.f32 %v1069_v53, %v959_v19  ;;  %1191 = vtanh.f32 %v654_v51 }
 0x1c8   : > { %v1180_v56 = vpop.eup %1179  ;;  %v656_v58 = vpop.f32.mrf.mxu1 }
 0x1c9   : > { %v1182_v59 = vpop.eup %1181  ;;  %v657_v60 = vadd.f32 %v959_v19, %v656_v58  ;;  %v686_v61 = vpack.c.bf16 %v1180_v56, %v1176_v52  ;;  %1193 = vtanh.f32 %v665_v55 }
 0x1ca   : > { %v687_v62 = vpack.c.bf16 %v1178_v54, %v1182_v59 }
 0x1cb   : > { %1195 = vtanh.f32 %v657_v60  ;;  %1090 = vmatprep.mubr.bf16.mxu0 %v686_v61 }
 0x1cc   : > { %1197 = vtanh.f32 %v662_v57  ;;  %1091 = vmatmul.mubr.bf16.gmra.mxu0 %v687_v62  ;;  %v1184_v63 = vpop.eup %1183 }
 0x1ce   : > { %v1186_v0 = vpop.eup %1185 }
 0x1d0   : > { %v1188_v1 = vpop.eup %1187 }
 0x1d1   : > { %v1190_v2 = vpop.eup %1189  ;;  %v688_v3 = vpack.c.bf16 %v1188_v1, %v1184_v63 }
 0x1d2   : > { %v689_v4 = vpack.c.bf16 %v1186_v0, %v1190_v2 }
 0x1d3   : > { %1094 = vmatprep.mubr.bf16.mxu0 %v688_v3 }
 0x1d4   : > { %1095 = vmatmul.mubr.bf16.gmra.mxu0 %v689_v4  ;;  %v1192_v5 = vpop.eup %1191 }
 0x1d6   : > { %v1194_v6 = vpop.eup %1193 }
 0x1d8   : > { %v1196_v7 = vpop.eup %1195 }
 0x1d9   : > { %v1198_v8 = vpop.eup %1197  ;;  %v690_v9 = vpack.c.bf16 %v1196_v7, %v1192_v5 }
 0x1da   : > { %v691_v10 = vpack.c.bf16 %v1194_v6, %v1198_v8 }
 0x1db   : > { %1098 = vmatprep.mubr.bf16.mxu0 %v690_v9 }
 0x1dc   : > { %1099 = vmatmul.mubr.bf16.gmra.mxu0 %v691_v10 }
 0x284   : > { %v1088_v12 = vpop.f32.mrf.mxu0 }
 0x285   : > { %v806_v13 = vadd.f32 %v1088_v12, %v968_v11 }
 0x286   : > { %v797_v14 = vpop.f32.mrf.mxu0 }
 0x287   : > { %862 = vst [vmem:[%s1333_s9 + $0x10] sm:$0xff] %v806_v13  ;;  %v798_v15 = vadd.f32 %v968_v11, %v797_v14 }
 0x288   : > { %v1089_v16 = vpop.f32.mrf.mxu0 }
 0x289   : > { %860 = vst [vmem:[%s1333_s9] sm:$0xff] %v798_v15  ;;  %v809_v17 = vadd.f32 %v1089_v16, %v968_v11 }
 0x28a   : > { %v800_v18 = vpop.f32.mrf.mxu0 }
 0x28b   : > { %863 = vst [vmem:[%s1333_s9 + $0x18] sm:$0xff] %v809_v17  ;;  %v801_v19 = vadd.f32 %v968_v11, %v800_v18 }
 0x28c   : > { %v1092_v20 = vpop.f32.mrf.mxu0 }
 0x28d   : > { %861 = vst [vmem:[%s1333_s9 + $0x8] sm:$0xff] %v801_v19  ;;  %v822_v21 = vadd.f32 %v1092_v20, %v968_v11 }
 0x28e   : > { %v813_v22 = vpop.f32.mrf.mxu0 }
 0x28f   : > { %866 = vst [vmem:[%s1333_s9 + $0x30] sm:$0xff] %v822_v21  ;;  %v814_v23 = vadd.f32 %v968_v11, %v813_v22 }
 0x290   : > { %v1093_v24 = vpop.f32.mrf.mxu0 }
 0x291   : > { %864 = vst [vmem:[%s1333_s9 + $0x20] sm:$0xff] %v814_v23  ;;  %v825_v25 = vadd.f32 %v1093_v24, %v968_v11 }
 0x292   : > { %v816_v26 = vpop.f32.mrf.mxu0 }
 0x293   : > { %867 = vst [vmem:[%s1333_s9 + $0x38] sm:$0xff] %v825_v25  ;;  %v817_v27 = vadd.f32 %v968_v11, %v816_v26 }
 0x294   : > { %v1096_v28 = vpop.f32.mrf.mxu0 }
 0x295   : > { %865 = vst [vmem:[%s1333_s9 + $0x28] sm:$0xff] %v817_v27  ;;  %v838_v29 = vadd.f32 %v1096_v28, %v968_v11 }
 0x296   : > { %v829_v30 = vpop.f32.mrf.mxu0 }
 0x297   : > { %870 = vst [vmem:[%s1333_s9 + $0x50] sm:$0xff] %v838_v29  ;;  %v830_v31 = vadd.f32 %v968_v11, %v829_v30 }
 0x298   : > { %v1097_v32 = vpop.f32.mrf.mxu0 }
 0x299   : > { %868 = vst [vmem:[%s1333_s9 + $0x40] sm:$0xff] %v830_v31  ;;  %v841_v33 = vadd.f32 %v1097_v32, %v968_v11 }
 0x29a   : > { %v832_v34 = vpop.f32.mrf.mxu0 }
 0x29b   : > { %871 = vst [vmem:[%s1333_s9 + $0x58] sm:$0xff] %v841_v33  ;;  %v833_v35 = vadd.f32 %v968_v11, %v832_v34 }
 0x29c   : > { %v1100_v36 = vpop.f32.mrf.mxu0 }
 0x29d   : > { %869 = vst [vmem:[%s1333_s9 + $0x48] sm:$0xff] %v833_v35  ;;  %v854_v37 = vadd.f32 %v1100_v36, %v968_v11 }
 0x29e   : > { %v845_v38 = vpop.f32.mrf.mxu0 }
 0x29f   : > { %874 = vst [vmem:[%s1333_s9 + $0x70] sm:$0xff] %v854_v37  ;;  %v846_v39 = vadd.f32 %v968_v11, %v845_v38 }
 0x2a0   : > { %v1101_v40 = vpop.f32.mrf.mxu0 }
 0x2a1   : > { %872 = vst [vmem:[%s1333_s9 + $0x60] sm:$0xff] %v846_v39  ;;  %v857_v41 = vadd.f32 %v1101_v40, %v968_v11 }
 0x2a2   : > { %v848_v42 = vpop.f32.mrf.mxu0 }
 0x2a3   : > { %875 = vst [vmem:[%s1333_s9 + $0x78] sm:$0xff] %v857_v41  ;;  %v849_v43 = vadd.f32 %v968_v11, %v848_v42 }
 0x2a5   : > { %873 = vst [vmem:[%s1333_s9 + $0x68] sm:$0xff] %v849_v43 }
 0x2a6 PF: > { %s17_s24 = sadd.s32 1, %s1205_s24  }
 0x2a7   : > { %p14_p4 = scmp.ge.s32.totalorder %s17_s24, 4  }
 0x2a9   :  { %16 = sbr.rel (!%p14_p4) target bundleno = 1 (0x1), region = 78 }

</bundles_post_ra>
